<compile_context>
chip_gen: v7x
topology: tpu7x:2x2x1
jax: 0.10.0
libtpu: 0.0.40
codegen_flags: <defaults>
</compile_context>

<pallas_src>
import jax
import jax.numpy as jnp
from jax.experimental import pallas as pl
from jax.experimental.pallas import tpu as pltpu

B, J, V, H_G, H_M = 2, 16, 64, 32, 32      # batch, joints, mesh verts, hidden dims
BJ, BV = B * J, B * V                      # 32, 128  (lane widths inside the kernel)
LANES = 128


def _pad8(n):
    return -(-n // 8) * 8


def _pack_rows(pieces):
    """Stack 2-D arrays into one (R, 128) f32 slab.  Each piece starts at an
    8-aligned row and occupies its natural number of columns (<= 128)."""
    offs, rows = [], 0
    for p in pieces:
        offs.append(rows)
        rows += _pad8(p.shape[0])
    slab = jnp.zeros((rows, LANES), jnp.float32)
    for o, p in zip(offs, pieces):
        slab = slab.at[o:o + p.shape[0], :p.shape[1]].set(p.astype(jnp.float32))
    return slab, tuple(offs)


def prepare_params(params):
    """One-time (module-init-style) packing of the raw parameters into a
    single kernel-ready weight slab (transposed weights, block-diagonal
    batched graph operators, 1/1000 folded into wm1b)."""
    (adj, wg1, bg1, wg2, bg2, up, lap, wm1a, wm1b, bm1, wm2, bm2) = params
    eye_b = jnp.eye(B, dtype=jnp.float32)
    adj_bd = jnp.kron(eye_b, adj.T)     # (BJ, BJ)   per-batch block = adj^T
    up_bd = jnp.kron(eye_b, up.T)       # (BJ, BV)   per-batch block = up^T
    lap_bd = jnp.kron(eye_b, lap.T)     # (BV, BV)   per-batch block = lap^T
    pieces = [
        wg1.T,                # 0: (H_G, 2)
        bg1.T,                # 1: (H_G, 1)
        wg2.T,                # 2: (3, H_G)
        bg2.T,                # 3: (3, 1)
        adj_bd,               # 4: (BJ, BJ)
        wm1a.T,               # 5: (H_M, 2)
        (wm1b / 1000.0).T,    # 6: (H_M, 3)  -- /1000 of pose3d folded in here
        bm1.T,                # 7: (H_M, 1)
        wm2.T,                # 8: (3, H_M)
        bm2.T,                # 9: (3, 1)
        up_bd,                # 10: (BJ, BV)
        lap_bd,               # 11: (BV, BV)
    ]
    return _pack_rows(pieces)


def _build_call(offsets, slab_shape):
    (o_wg1, o_bg1, o_wg2, o_bg2, o_adj,
     o_m1a, o_m1b, o_bm1, o_wm2, o_bm2, o_up, o_lap) = offsets

    def kernel(x_ref, w_ref, mesh_ref, p3d_ref):
        dot = lambda a, b: jnp.dot(a, b, preferred_element_type=jnp.float32)
        x_t = x_ref[...]                                        # (2, BJ)
        adj_bd = w_ref[o_adj:o_adj + BJ, 0:BJ]                  # (BJ, BJ)

        # ---- diffpose (gcndiff): 2-layer GCN, 2 -> H_G -> 3 (transposed) ----
        h1 = dot(dot(w_ref[o_wg1:o_wg1 + H_G, 0:2], x_t), adj_bd) \
             + w_ref[o_bg1:o_bg1 + H_G, 0:1]                    # (H_G, BJ)
        h1 = jnp.maximum(h1, 0.0)
        p3d_t = dot(dot(w_ref[o_wg2:o_wg2 + 3, 0:H_G], h1), adj_bd) \
                + w_ref[o_bg2:o_bg2 + 3, 0:1]                   # (3, BJ)

        # ---- pose_combine = cat([pose2d, pose3d/1000], dim=2)  ----
        # concat realised as a split matmul; the 1/1000 is pre-folded into wm1b.
        pre = dot(w_ref[o_m1a:o_m1a + H_M, 0:2], x_t) \
              + dot(w_ref[o_m1b:o_m1b + H_M, 0:3], p3d_t)       # (H_M, BJ)

        # ---- pose2mesh (meshnet): upsample joints->verts, GCN 5 -> H_M -> 3 ----
        hm = jnp.maximum(dot(pre, w_ref[o_up:o_up + BJ, 0:BV])
                         + w_ref[o_bm1:o_bm1 + H_M, 0:1], 0.0)  # (H_M, BV)
        mesh_t = dot(dot(w_ref[o_wm2:o_wm2 + 3, 0:H_M], hm),
                     w_ref[o_lap:o_lap + BV, 0:BV]) \
                 + w_ref[o_bm2:o_bm2 + 3, 0:1]                  # (3, BV)

        mesh_ref[...] = mesh_t            # lane-dense (3, 128) unmasked store
        p3d_ref[...] = p3d_t              # (3, 32)

    return pl.pallas_call(
        kernel,
        out_shape=(jax.ShapeDtypeStruct((3, BV), jnp.float32),   # cam_mesh^T
                   jax.ShapeDtypeStruct((3, BJ), jnp.float32)),  # pose3d^T
        grid=(1,),
        in_specs=[
            pl.BlockSpec((2, BJ), lambda i: (0, 0)),        # pose2d (transposed)
            pl.BlockSpec(slab_shape, lambda i: (0, 0)),     # packed weight slab
        ],
        out_specs=(
            pl.BlockSpec((3, BV), lambda i: (0, 0)),
            pl.BlockSpec((3, BJ), lambda i: (0, 0)),
        ),
        compiler_params=pltpu.CompilerParams(
            dimension_semantics=("arbitrary",)),
    )


def diffpose2mesh(pose2d, slab, offsets):
    b, j, _ = pose2d.shape
    # lane index = batch * J + joint  (matches the block-diagonal operators)
    x_t = jnp.transpose(pose2d, (2, 0, 1)).reshape(2, b * j)
    mesh_t, p3d_t = _build_call(offsets, slab.shape)(x_t, slab)
    cam_mesh = jnp.transpose(mesh_t.reshape(3, b, V), (1, 2, 0))   # (B, V, 3)
    pose3d = jnp.transpose(p3d_t.reshape(3, b, j), (1, 2, 0))      # (B, J, 3)
    return cam_mesh, pose3d


def _make_params(key):
    ks = jax.random.split(key, 12)
    # Row-normalized adjacency over joints (self-loops + random edges).
    a = jnp.abs(jax.random.normal(ks[0], (J, J))) + jnp.eye(J)
    adj = a / jnp.sum(a, axis=1, keepdims=True)
    wg1 = jax.random.normal(ks[1], (2, H_G)) * 0.1
    bg1 = jax.random.normal(ks[2], (1, H_G)) * 0.01
    wg2 = jax.random.normal(ks[3], (H_G, 3)) * 0.1
    bg2 = jax.random.normal(ks[4], (1, 3)) * 0.01
    up = jax.random.normal(ks[5], (V, J)) * 0.1        # joint -> mesh-vert upsample
    l = jnp.abs(jax.random.normal(ks[6], (V, V))) + jnp.eye(V)
    lap = l / jnp.sum(l, axis=1, keepdims=True)        # normalized mesh graph op
    wm1a = jax.random.normal(ks[7], (2, H_M)) * 0.1
    wm1b = jax.random.normal(ks[8], (3, H_M)) * 0.1
    bm1 = jax.random.normal(ks[9], (1, H_M)) * 0.01
    wm2 = jax.random.normal(ks[10], (H_M, 3)) * 0.1
    bm2 = jax.random.normal(ks[11], (1, 3)) * 0.01
    return tuple(x.astype(jnp.float32)
                 for x in (adj, wg1, bg1, wg2, bg2, up, lap,
                           wm1a, wm1b, bm1, wm2, bm2))


def _reference(pose2d, params):
    (adj, wg1, bg1, wg2, bg2, up, lap, wm1a, wm1b, bm1, wm2, bm2) = params
    h = jnp.maximum(jnp.einsum('ij,bjc->bic', adj, pose2d @ wg1) + bg1, 0.0)
    pose3d = jnp.einsum('ij,bjc->bic', adj, h @ wg2) + bg2
    pc = jnp.concatenate([pose2d, pose3d / 1000.0], axis=2)
    wm1 = jnp.concatenate([wm1a, wm1b], axis=0)
    hm = jnp.maximum(jnp.einsum('vj,bjc->bvc', up, pc @ wm1) + bm1, 0.0)
    mesh = jnp.einsum('vw,bwc->bvc', lap, hm @ wm2) + bm2
    return mesh, pose3d


if __name__ == "__main__":
    key = jax.random.PRNGKey(0)
    k_in, k_par = jax.random.split(key)
    pose2d = jax.random.normal(k_in, (B, J, 2), dtype=jnp.float32)
    params = _make_params(k_par)
    slab, offsets = prepare_params(params)

    cam_mesh, pose3d = diffpose2mesh(pose2d, slab, offsets)
    jax.block_until_ready((cam_mesh, pose3d))

    ref_mesh, ref_p3d = _reference(pose2d, params)
    assert cam_mesh.shape == (B, V, 3) and pose3d.shape == (B, J, 3)
    assert jnp.allclose(cam_mesh, ref_mesh, atol=1e-4, rtol=1e-4)
    assert jnp.allclose(pose3d, ref_p3d, atol=1e-4, rtol=1e-4)
    print("KERNEL_OK")
</pallas_src>

<mosaic_0001>
module attributes {stable_mosaic.version = 11 : i64} {
  func.func @kernel(%arg0: i32, %arg1: memref<2x32xf32, #tpu.memory_space<vmem>>, %arg2: memref<384x128xf32, #tpu.memory_space<vmem>>, %arg3: memref<3x128xf32, #tpu.memory_space<vmem>>, %arg4: memref<3x32xf32, #tpu.memory_space<vmem>>) attributes {dimension_semantics = [#tpu.dimension_semantics<arbitrary>], iteration_bounds = array<i64: 1>, scalar_prefetch = 0 : i64, scratch_operands = 0 : i64, tpu.core_type = #tpu.core_type<tc>, window_params = [{pipeline_mode = #tpu.pipeline_mode<synchronous>, transform_indices = @transform_0, window_bounds = array<i64: 2, 32>}, {pipeline_mode = #tpu.pipeline_mode<synchronous>, transform_indices = @transform_1, window_bounds = array<i64: 384, 128>}, {pipeline_mode = #tpu.pipeline_mode<synchronous>, transform_indices = @transform_2, window_bounds = array<i64: 3, 128>}, {pipeline_mode = #tpu.pipeline_mode<synchronous>, transform_indices = @transform_3, window_bounds = array<i64: 3, 32>}]} {
    %c0 = arith.constant 0 : index
    %c0_0 = arith.constant 0 : index
    %0 = vector.load %arg1[%c0, %c0_0] : memref<2x32xf32, #tpu.memory_space<vmem>>, vector<2x32xf32>
    %c80 = arith.constant 80 : index
    %c0_1 = arith.constant 0 : index
    %1 = vector.load %arg2[%c80, %c0_1] : memref<384x128xf32, #tpu.memory_space<vmem>>, vector<32x32xf32>
    %c0_2 = arith.constant 0 : index
    %c0_3 = arith.constant 0 : index
    %2 = vector.load %arg2[%c0_2, %c0_3] : memref<384x128xf32, #tpu.memory_space<vmem>>, vector<32x2xf32>
    %cst = arith.constant dense<0.000000e+00> : vector<32x32xf32>
    %3 = tpu.matmul %2, %0, %cst {dimension_numbers = #tpu.dot_dimension_numbers<[1], [0], [0], [1], [0, 0, 1, 1], [], []>} : vector<32x2xf32>, vector<2x32xf32>, vector<32x32xf32> -> vector<32x32xf32>
    %cst_4 = arith.constant dense<0.000000e+00> : vector<32x32xf32>
    %4 = tpu.matmul %3, %1, %cst_4 {dimension_numbers = #tpu.dot_dimension_numbers<[1], [0], [0], [1], [0, 0, 1, 1], [], []>} : vector<32x32xf32>, vector<32x32xf32>, vector<32x32xf32> -> vector<32x32xf32>
    %c32 = arith.constant 32 : index
    %c0_5 = arith.constant 0 : index
    %5 = vector.load %arg2[%c32, %c0_5] : memref<384x128xf32, #tpu.memory_space<vmem>>, vector<32x1xf32>
    %6 = vector.broadcast %5 : vector<32x1xf32> to vector<32x32xf32>
    %7 = arith.addf %4, %6 : vector<32x32xf32>
    %cst_6 = arith.constant 0.000000e+00 : f32
    %8 = vector.broadcast %cst_6 : f32 to vector<32x32xf32>
    %9 = arith.maximumf %7, %8 : vector<32x32xf32>
    %c64 = arith.constant 64 : index
    %c0_7 = arith.constant 0 : index
    %10 = vector.load %arg2[%c64, %c0_7] : memref<384x128xf32, #tpu.memory_space<vmem>>, vector<3x32xf32>
    %cst_8 = arith.constant dense<0.000000e+00> : vector<3x32xf32>
    %11 = tpu.matmul %10, %9, %cst_8 {dimension_numbers = #tpu.dot_dimension_numbers<[1], [0], [0], [1], [0, 0, 1, 1], [], []>} : vector<3x32xf32>, vector<32x32xf32>, vector<3x32xf32> -> vector<3x32xf32>
    %cst_9 = arith.constant dense<0.000000e+00> : vector<3x32xf32>
    %12 = tpu.matmul %11, %1, %cst_9 {dimension_numbers = #tpu.dot_dimension_numbers<[1], [0], [0], [1], [0, 0, 1, 1], [], []>} : vector<3x32xf32>, vector<32x32xf32>, vector<3x32xf32> -> vector<3x32xf32>
    %c72 = arith.constant 72 : index
    %c0_10 = arith.constant 0 : index
    %13 = vector.load %arg2[%c72, %c0_10] : memref<384x128xf32, #tpu.memory_space<vmem>>, vector<3x1xf32>
    %14 = vector.broadcast %13 : vector<3x1xf32> to vector<3x32xf32>
    %15 = arith.addf %12, %14 : vector<3x32xf32>
    %c112 = arith.constant 112 : index
    %c0_11 = arith.constant 0 : index
    %16 = vector.load %arg2[%c112, %c0_11] : memref<384x128xf32, #tpu.memory_space<vmem>>, vector<32x2xf32>
    %cst_12 = arith.constant dense<0.000000e+00> : vector<32x32xf32>
    %17 = tpu.matmul %16, %0, %cst_12 {dimension_numbers = #tpu.dot_dimension_numbers<[1], [0], [0], [1], [0, 0, 1, 1], [], []>} : vector<32x2xf32>, vector<2x32xf32>, vector<32x32xf32> -> vector<32x32xf32>
    %c144 = arith.constant 144 : index
    %c0_13 = arith.constant 0 : index
    %18 = vector.load %arg2[%c144, %c0_13] : memref<384x128xf32, #tpu.memory_space<vmem>>, vector<32x3xf32>
    %cst_14 = arith.constant dense<0.000000e+00> : vector<32x32xf32>
    %19 = tpu.matmul %18, %15, %cst_14 {dimension_numbers = #tpu.dot_dimension_numbers<[1], [0], [0], [1], [0, 0, 1, 1], [], []>} : vector<32x3xf32>, vector<3x32xf32>, vector<32x32xf32> -> vector<32x32xf32>
    %20 = arith.addf %17, %19 : vector<32x32xf32>
    %c224 = arith.constant 224 : index
    %c0_15 = arith.constant 0 : index
    %21 = vector.load %arg2[%c224, %c0_15] : memref<384x128xf32, #tpu.memory_space<vmem>>, vector<32x128xf32>
    %cst_16 = arith.constant dense<0.000000e+00> : vector<32x128xf32>
    %22 = tpu.matmul %20, %21, %cst_16 {dimension_numbers = #tpu.dot_dimension_numbers<[1], [0], [0], [1], [0, 0, 1, 1], [], []>} : vector<32x32xf32>, vector<32x128xf32>, vector<32x128xf32> -> vector<32x128xf32>
    %c176 = arith.constant 176 : index
    %c0_17 = arith.constant 0 : index
    %23 = vector.load %arg2[%c176, %c0_17] : memref<384x128xf32, #tpu.memory_space<vmem>>, vector<32x1xf32>
    %24 = vector.broadcast %23 : vector<32x1xf32> to vector<32x128xf32>
    %25 = arith.addf %22, %24 : vector<32x128xf32>
    %cst_18 = arith.constant 0.000000e+00 : f32
    %26 = vector.broadcast %cst_18 : f32 to vector<32x128xf32>
    %27 = arith.maximumf %25, %26 : vector<32x128xf32>
    %c208 = arith.constant 208 : index
    %c0_19 = arith.constant 0 : index
    %28 = vector.load %arg2[%c208, %c0_19] : memref<384x128xf32, #tpu.memory_space<vmem>>, vector<3x32xf32>
    %cst_20 = arith.constant dense<0.000000e+00> : vector<3x128xf32>
    %29 = tpu.matmul %28, %27, %cst_20 {dimension_numbers = #tpu.dot_dimension_numbers<[1], [0], [0], [1], [0, 0, 1, 1], [], []>} : vector<3x32xf32>, vector<32x128xf32>, vector<3x128xf32> -> vector<3x128xf32>
    %c256 = arith.constant 256 : index
    %c0_21 = arith.constant 0 : index
    %30 = vector.load %arg2[%c256, %c0_21] : memref<384x128xf32, #tpu.memory_space<vmem>>, vector<128x128xf32>
    %cst_22 = arith.constant dense<0.000000e+00> : vector<3x128xf32>
    %31 = tpu.matmul %29, %30, %cst_22 {dimension_numbers = #tpu.dot_dimension_numbers<[1], [0], [0], [1], [0, 0, 1, 1], [], []>} : vector<3x128xf32>, vector<128x128xf32>, vector<3x128xf32> -> vector<3x128xf32>
    %c216 = arith.constant 216 : index
    %c0_23 = arith.constant 0 : index
    %32 = vector.load %arg2[%c216, %c0_23] : memref<384x128xf32, #tpu.memory_space<vmem>>, vector<3x1xf32>
    %33 = vector.broadcast %32 : vector<3x1xf32> to vector<3x128xf32>
    %34 = arith.addf %31, %33 : vector<3x128xf32>
    %c0_24 = arith.constant 0 : index
    %c0_25 = arith.constant 0 : index
    %35 = vector.load %arg3[%c0_24, %c0_25] : memref<3x128xf32, #tpu.memory_space<vmem>>, vector<3x128xf32>
    tpu.vector_store %arg3[%c0_24, %c0_25], %34 {strides = array<i32>} : memref<3x128xf32, #tpu.memory_space<vmem>>, vector<3x128xf32>,
    %c0_26 = arith.constant 0 : index
    %c0_27 = arith.constant 0 : index
    %36 = vector.load %arg4[%c0_26, %c0_27] : memref<3x32xf32, #tpu.memory_space<vmem>>, vector<3x32xf32>
    tpu.vector_store %arg4[%c0_26, %c0_27], %15 {strides = array<i32>} : memref<3x32xf32, #tpu.memory_space<vmem>>, vector<3x32xf32>,
    return
  }
  func.func @transform_0(%arg0: i32) -> (i32, i32) {
    %c0_i32 = arith.constant 0 : i32
    %c0_i32_0 = arith.constant 0 : i32
    %c0_i32_1 = arith.constant 0 : i32
    return %c0_i32, %c0_i32_0 : i32, i32
  }
  func.func @transform_1(%arg0: i32) -> (i32, i32) {
    %c0_i32 = arith.constant 0 : i32
    %c0_i32_0 = arith.constant 0 : i32
    %c0_i32_1 = arith.constant 0 : i32
    return %c0_i32, %c0_i32_0 : i32, i32
  }
  func.func @transform_2(%arg0: i32) -> (i32, i32) {
    %c0_i32 = arith.constant 0 : i32
    %c0_i32_0 = arith.constant 0 : i32
    %c0_i32_1 = arith.constant 0 : i32
    return %c0_i32, %c0_i32_0 : i32, i32
  }
  func.func @transform_3(%arg0: i32) -> (i32, i32) {
    %c0_i32 = arith.constant 0 : i32
    %c0_i32_0 = arith.constant 0 : i32
    %c0_i32_1 = arith.constant 0 : i32
    return %c0_i32, %c0_i32_0 : i32, i32
  }
}

</mosaic_0001>

<bundles_post_ra>
// kernel: tpu_custom_call.1
= control target key start
LH: loop header
LB: loop body
LE: loop exit
PB: predicated region body
PF: predicated region fallthrough
CT: control target
= control target key end

     0   :  { %9 = vsyncpa [#allocation3], 0  ;;  %s1495_s0 = inlined_call_operand.hbm [shape: f32[2,32], index: 0, kind: input, shape index: {}]   ;;  %s1496_s1 = inlined_call_operand.hbm [shape: f32[384,128], index: 1, kind: input, shape index: {}]   ;;  %s1497_s2 = inlined_call_operand.hbm [shape: f32[3,128], index: 2, kind: output, shape index: {0}]   ;;  %s1498_s3 = inlined_call_operand.hbm [shape: f32[3,32], index: 3, kind: output, shape index: {1}]  }
   0x1   :  { %10 = vsyncpa [#allocation6], 0 }
   0x2   :  { %11 = vsyncpa [#allocation4], 0 }
   0x3   :  { %12 = vsyncpa [#allocation9], 0  ;;  %s1345_s12 = smov [#allocation2]   ;;  %s1346_s14 = smov [#allocation5]  }
   0x4   :  { %s19_s13 = sshll.u32 %s1345_s12, 4  ;;  %s28_s15 = sshll.u32 %s1346_s14, 4  ;;  %s20_s13 = int_to_ptr.vmem [resolvable:$true] %s19_s13  ;;  %s1375_s15 = int_to_ptr.vmem [resolvable:$true] %s28_s15 }
   0x5   :  { %s1249_s18 = scalar_lea.hbm %s1495_s0, 32 }
   0x6   :  { %p1250_p0 = scmp.ne.s32.totalorder %s1495_s0, %s1249_s18  ;;  %p1253_p1 = scmp.lt.u32.totalorder %s1249_s18, %s1495_s0 }
   0x8   :  { %p1255_p2 = pnand %p1253_p1, %p1250_p0 }
   0xa   :  { %1258 = shalt.err (!%p1255_p2)
}
   0xb   :  { %s1259_s23 = scalar_lea.vmem %s20_s13, 32  ;;  %p1264_p4 = scmp.lt.s32.totalorder %s20_s13, %s20_s13 }
   0xc   :  { %p1260_p3 = scmp.ne.s32.totalorder %s20_s13, %s1259_s23  ;;  %p1265_p5 = scmp.lt.s32.totalorder %s1259_s23, %s1259_s23 }
   0xe   :  { %p1266_p6 = por %p1265_p5, %p1264_p4 }
  0x10   :  { %p1267_p7 = pnand %p1266_p6, %p1260_p3 }
  0x12   :  { %1270 = shalt.err (!%p1267_p7)
}
  0x13   :  { %22 = dma.hbm_to_vmem [thread:$0]  %s1495_s0, 32, %s20_s13, [#allocation3]  }
  0x14   :  { %s1271_s28 = scalar_lea.hbm %s1496_s1, 6144 }
  0x15   :  { %p1272_p8 = scmp.ne.s32.totalorder %s1496_s1, %s1271_s28  ;;  %p1275_p9 = scmp.lt.u32.totalorder %s1271_s28, %s1496_s1 }
  0x17   :  { %p1277_p10 = pnand %p1275_p9, %p1272_p8 }
  0x19   :  { %1280 = shalt.err (!%p1277_p10)
}
  0x1a   :  { %s1281_s6 = scalar_lea.vmem %s1375_s15, 6144  ;;  %p1286_p12 = scmp.lt.s32.totalorder %s1375_s15, %s1375_s15 }
  0x1b   :  { %p1282_p11 = scmp.ne.s32.totalorder %s1375_s15, %s1281_s6  ;;  %p1287_p13 = scmp.lt.s32.totalorder %s1281_s6, %s1281_s6 }
  0x1d   :  { %p1288_p0 = por %p1287_p13, %p1286_p12 }
  0x1f   :  { %p1289_p1 = pnand %p1288_p0, %p1282_p11 }
  0x21   :  { %1292 = shalt.err (!%p1289_p1)
}
  0x22   :  { %s1347_s0 = smov 128   ;;  %s1348_s7 = smov 8  }
  0x23   :  { %34 = dma.hbm_to_vmem [thread:$0]  %s1496_s1, 6144, %s1375_s15, [#allocation6], %s1347_s0, %s1347_s0, %s1348_s7  }
  0x24   :  { %1337 = dma.done.wait [#allocation3], 32  }
  0x25   :  { %1338 = vsyncadd [#allocation3], 4294967264 }
  0x26   :  { %1339 = dma.done.wait [#allocation6], 6144  }
  0x27   :  { %1340 = vsyncadd [#allocation6], 4294961152  ;;  %vm63_vm0 = vcmask 1041408   ;;  %vm50_vm1 = vcmask 15360   ;;  %v1406_v0 = vld [vmem:[#allocation2] sm:$0x3] }
  0x28   :  { %v46_v1 = vld [vmem:[#allocation5] sm:$0xff]  ;;  %v47_v2 = vld [vmem:[#allocation5 + $0x8] sm:$0xff]  ;;  %1055 = vmatprep.subr.msk.mxu0 %vm63_vm0, %v1406_v0  ;;  %v48_v3 = vld [vmem:[#allocation5 + $0x10] sm:$0xff]  ;;  %v1349_v13 = vmov 0   ;;  %vm176_vm2 = vcmask 261120   ;;  %v1350_v26 = vmov 0.0|0.0  }
  0x29   :  { %1057 = vmatprep.mubr.msk.f32.mxu0 %vm50_vm1, %v46_v1  ;;  %v42_v4 = vld [vmem:[#allocation5 + $0x50] sm:$0xff]  ;;  %1056 = vmatpush3.msk.msra.mxu0 %vm63_vm0, %v1406_v0  ;;  %v43_v5 = vld [vmem:[#allocation5 + $0x58] sm:$0xff]  ;;  %v44_v6 = vld [vmem:[#allocation5 + $0x60] sm:$0xff]  ;;  %vm1351_vm3 = vmmov 0   ;;  %v1352_v27 = vmov 0.0   ;;  %vm439_vm4 = vcmask 23552  }
  0x2a   :  { %v45_v7 = vld [vmem:[#allocation5 + $0x68] sm:$0xff]  ;;  %1058 = vmatmul.mubr.msk.f32.vlgmr.msra.gmra.mrb[0].mxu0 %vm50_vm1, %v47_v2  ;;  %v1414_v8 = vpack.c.bf16 %v43_v5, %v42_v4  ;;  %v49_v10 = vld [vmem:[#allocation5 + $0x18] sm:$0xff]  ;;  %v152_v11 = vld [vmem:[#allocation5 + $0x20] sm:$0xff]  ;;  %1247 = vset.pattern.permute.xlu0 %v1349_v13  ;;  %vm452_vm5 = vcmask 1042432   ;;  %vm934_vm6 = vcmask 256000   ;;  %s1353_s1 = smov [#allocation8]  }
  0x2b   :  { %v1416_v9 = vpack.c.bf16 %v45_v7, %v44_v6  ;;  %1060 = vmatprep.mubr.msk.f32.mxu0 %vm50_vm1, %v48_v3  ;;  %v154_v12 = vld [vmem:[#allocation5 + $0x30] sm:$0xff]  ;;  %1248 = vset.pattern.permute.xlu1 %v1349_v13  ;;  %v153_v14 = vld [vmem:[#allocation5 + $0x28] sm:$0xff]  ;;  %v155_v15 = vld [vmem:[#allocation5 + $0x38] sm:$0xff]  ;;  %s952_s10 = sshll.u32 %s1353_s1, 4  ;;  %s953_s10 = int_to_ptr.vmem [resolvable:$true] %s952_s10 }
  0x2c   :  { %1176 = vmatprep.subr.bf16.mxu0 %v1414_v8  ;;  %158 = vperm.xlu0 %1247, %v152_v11   ;;  %v352_v16 = vld [vmem:[#allocation5 + $0x48] sm:$0x7]  ;;  %v642_v17 = vld [vmem:[#allocation5 + $0xb0] sm:$0xff]  ;;  %v643_v18 = vld [vmem:[#allocation5 + $0xb8] sm:$0xff]  ;;  %s1293_s11 = scalar_lea.vmem %s953_s10, 64  ;;  %p1298_p3 = scmp.lt.s32.totalorder %s953_s10, %s953_s10 }
  0x2d   :  { %1178 = vmatpush3.bf16.msra.mxu0 %v1414_v8  ;;  %168 = vperm.xlu1 %1248, %v154_v12   ;;  %v644_v19 = vld [vmem:[#allocation5 + $0xc0] sm:$0xff]  ;;  %v645_v20 = vld [vmem:[#allocation5 + $0xc8] sm:$0xff]  ;;  %v857_v21 = vld [vmem:[#allocation5 + $0xd8] sm:$0x7]  ;;  %p1294_p2 = scmp.ne.s32.totalorder %s953_s10, %s1293_s11  ;;  %p1299_p4 = scmp.lt.s32.totalorder %s1293_s11, %s1293_s11 }
  0x2e   :  { %1061 = vmatmul.mubr.msk.f32.gmra.mrb[2].mxu0 %vm50_vm1, %v49_v10  ;;  %1180 = vmatprep.subr.bf16.mxu0 %v1416_v9  ;;  %v278_v46 = vld [vmem:[#allocation5 + $0x40] sm:$0x7]  ;;  %v431_v49 = vld [vmem:[#allocation5 + $0x70] sm:$0xff]  ;;  %v432_v51 = vld [vmem:[#allocation5 + $0x78] sm:$0xff] }
  0x2f   :  { %v435_v50 = vld [vmem:[#allocation5 + $0x90] sm:$0xff]  ;;  %v433_v52 = vld [vmem:[#allocation5 + $0x80] sm:$0xff]  ;;  %v434_v53 = vld [vmem:[#allocation5 + $0x88] sm:$0xff]  ;;  %p1300_p5 = por %p1299_p4, %p1298_p3 }
  0x30   :  { %163 = vperm.xlu0 %1247, %v153_v14   ;;  %1101 = vmatprep.mubr.msk.f32.mxu1 %vm439_vm4, %v435_v50  ;;  %v638_v54 = vld [vmem:[#allocation5 + $0xe0] sm:$0xff]  ;;  %v639_v55 = vld [vmem:[#allocation5 + $0xe8] sm:$0xff]  ;;  %v436_v61 = vld [vmem:[#allocation5 + $0x98] sm:$0xff] }
  0x31   :  { %1182 = vmatpush3.bf16.msra.mxu0 %v1416_v9  ;;  %173 = vperm.xlu1 %1248, %v155_v15   ;;  %v1195_v60 = vpack.c.bf16 %v639_v55, %v638_v54  ;;  %v437_v62 = vld [vmem:[#allocation5 + $0xa0] sm:$0xff]  ;;  %v438_v63 = vld [vmem:[#allocation5 + $0xa8] sm:$0xff]  ;;  %v641_v1 = vld [vmem:[#allocation5 + $0xf8] sm:$0xff]  ;;  %p1301_p6 = pnand %p1300_p5, %p1294_p2 }
  0x32   :  { %1183 = vmatprep.subr.bf16.mxu0 %v1350_v26  ;;  %v841_v15 = vld [vmem:[#allocation5 + $0x100] sm:$0xff] }
  0x34   :  { %355 = vperm.xlu0 %1247, %v352_v16   ;;  %v842_v16 = vld [vmem:[#allocation5 + $0x108] sm:$0xff] }
  0x35   :  { %648 = vperm.xlu1 %1248, %v642_v17   ;;  %v843_v17 = vld [vmem:[#allocation5 + $0x110] sm:$0xff] }
  0x38   :  { %653 = vperm.xlu0 %1247, %v643_v18   ;;  %v1210_v18 = vpack.c.bf16 %v842_v16, %v841_v15 }
  0x39   :  { %658 = vperm.xlu1 %1248, %v644_v19   ;;  %v844_v19 = vld [vmem:[#allocation5 + $0x118] sm:$0xff] }
  0x3c   :  { %663 = vperm.xlu0 %1247, %v645_v20   ;;  %v1213_v20 = vpack.c.bf16 %v844_v19, %v843_v17 }
  0x3d   :  { %860 = vperm.xlu1 %1248, %v857_v21   ;;  %v845_v21 = vld [vmem:[#allocation5 + $0x120] sm:$0xff] }
  0xab   :  { %v159_v28 = vpop.permute.xlu0 %158 }
  0xac   :  { %v169_v29 = vpop.permute.xlu1 %168 }
  0xaf   :  { %v164_v30 = vpop.permute.xlu0 %163 }
  0xb0   :  { %v174_v36 = vpop.permute.xlu1 %173 }
  0xb3   :  { %v356_v56 = vpop.permute.xlu0 %355 }
  0xfd   :  { %v1059_v22 = vpop.f32.mrb[0].mxu0 }
  0xfe   :  { %v133_v23 = vpop.f32.mrb[1].mxu0 }
  0xff   :  { %1071 = vmatprep.mubr.msk.f32.mxu0 %vm176_vm2, %v133_v23 }
 0x100   :  { %1072 = vmatmul.mubr.msk.f32.vlgmr.msra.gmra.mrb[4].mxu0 %vm176_vm2, %v1059_v22  ;;  %v846_v22 = vld [vmem:[#allocation5 + $0x128] sm:$0xff] }
 0x101   :  { %v1062_v24 = vpop.f32.mrb[2].mxu0  ;;  %v1216_v23 = vpack.c.bf16 %v846_v22, %v845_v21 }
 0x102   :  { %v143_v25 = vpop.f32.mrb[3].mxu0 }
 0x103   :  { %1074 = vmatprep.mubr.msk.f32.mxu0 %vm176_vm2, %v143_v25  ;;  %v848_v25 = vld [vmem:[#allocation5 + $0x138] sm:$0xff] }
 0x104   :  { %1075 = vmatmul.mubr.msk.f32.gmra.mrb[6].mxu0 %vm176_vm2, %v1062_v24  ;;  %v847_v24 = vld [vmem:[#allocation5 + $0x130] sm:$0xff] }
 0x105   :  { %1085 = vmatprep.mubr.msk.f32.mxu0 %vm1351_vm3, %v1352_v27 }
 0x1d3   :  { %v1073_v31 = vpop.f32.mrb[4].mxu0 }
 0x1d4   :  { %v261_v32 = vadd.f32 %v1073_v31, %v164_v30  ;;  %v255_v33 = vpop.f32.mrb[5].mxu0  ;;  %v851_v31 = vld [vmem:[#allocation5 + $0x150] sm:$0xff] }
 0x1d5   :  { %v256_v34 = vadd.f32 %v255_v33, %v159_v28  ;;  %v1219_v28 = vpack.c.bf16 %v848_v25, %v847_v24 }
 0x1d6   :  { %v275_v35 = vmax.f32 %v261_v32, 0.0  ;;  %v852_v32 = vld [vmem:[#allocation5 + $0x158] sm:$0xff] }
 0x1d7   :  { %v274_v37 = vmax.f32 %v256_v34, 0.0  ;;  %v1076_v38 = vpop.f32.mrb[6].mxu0  ;;  %v1225_v33 = vpack.c.bf16 %v852_v32, %v851_v31  ;;  %v853_v34 = vld [vmem:[#allocation5 + $0x160] sm:$0xff] }
 0x1d8   :  { %v271_v39 = vadd.f32 %v1076_v38, %v174_v36  ;;  %v265_v40 = vpop.f32.mrb[7].mxu0  ;;  %v856_v38 = vld [vmem:[#allocation5 + $0x178] sm:$0xff] }
 0x1d9   :  { %v1184_v41 = vpack.c.bf16 %v275_v35, %v274_v37  ;;  %v266_v42 = vadd.f32 %v265_v40, %v169_v29  ;;  %v850_v29 = vld [vmem:[#allocation5 + $0x148] sm:$0xff]  ;;  %v855_v37 = vld [vmem:[#allocation5 + $0x170] sm:$0xff]  ;;  %v654_v40 = vpop.permute.xlu0 %653 }
 0x1da   :  { %v277_v43 = vmax.f32 %v271_v39, 0.0  ;;  %v854_v35 = vld [vmem:[#allocation5 + $0x168] sm:$0xff]  ;;  %v1231_v39 = vpack.c.bf16 %v856_v38, %v855_v37 }
 0x1db   :  { %v276_v44 = vmax.f32 %v266_v42, 0.0  ;;  %1185 = vmatpush3.bf16.msra.mxu0 %v1184_v41  ;;  %v1228_v36 = vpack.c.bf16 %v854_v35, %v853_v34  ;;  %v649_v41 = vpop.permute.xlu1 %648 }
 0x1dc   :  { %1186 = vmatprep.subr.bf16.mxu0 %v1350_v26 }
 0x1dd   :  { %v1187_v45 = vpack.c.bf16 %v277_v43, %v276_v44 }
 0x1df   :  { %1188 = vmatpush3.bf16.msra.mxu0 %v1187_v45  ;;  %v659_v50 = vpop.permute.xlu1 %658 }
 0x1e0   :  { %1189 = vmatprep.subr.bf16.mxu0 %v1350_v26 }
 0x1e2   :  { %1086 = vmatmul.mubr.msk.f32.vlgmr.msra.gmra.mrb[8].mxu0 %vm176_vm2, %v278_v46 }
 0x1e3   :  { %1191 = vmatpush3.bf16.msra.mxu0 %v1414_v8  ;;  %1096 = vmatprep.mubr.msk.f32.mxu0 %vm1351_vm3, %v1352_v27 }
 0x1e4   :  { %1192 = vmatprep.subr.bf16.mxu0 %v1350_v26 }
 0x1e7   :  { %1194 = vmatpush3.bf16.msra.mxu0 %v1416_v9 }
 0x1e8   :  { %1107 = vmatprep.subr.msk.mxu0 %vm63_vm0, %v1406_v0 }
 0x2b5   :  { %v348_v47 = vpop.f32.mrb[8].mxu0 }
 0x2b6   :  { %v1087_v48 = vpop.f32.mrb[9].mxu0  ;;  %1097 = vmatmul.mubr.msk.f32.vlgmr.msra.gmra.mrb[10].mxu0 %vm176_vm2, %v348_v47  ;;  %v664_v47 = vpop.permute.xlu0 %663 }
 0x2b7   :  { %1108 = vmatpush3.msk.msra.mxu0 %vm63_vm0, %v1406_v0  ;;  %1109 = vmatprep.mubr.msk.f32.mxu0 %vm50_vm1, %v431_v49  ;;  %v640_v0 = vld [vmem:[#allocation5 + $0xf0] sm:$0xff] }
 0x2b8   :  { %1203 = vmatprep.subr.bf16.mxu0 %v1350_v26  ;;  %v1199_v3 = vpack.c.bf16 %v641_v1, %v640_v0 }
 0x2ba   :  { %1110 = vmatmul.mubr.msk.f32.vlgmr.msra.gmra.mrb[12].mxu0 %vm50_vm1, %v432_v51 }
 0x2bb   :  { %1112 = vmatprep.mubr.msk.f32.mxu0 %vm50_vm1, %v433_v52 }
 0x2be   :  { %1113 = vmatmul.mubr.msk.f32.gmra.mrb[14].mxu0 %vm50_vm1, %v434_v53 }
 0x2bf   :  { %1137 = vmatprep.mubr.msk.f32.mxu0 %vm1351_vm3, %v1352_v27 }
 0x389   :  { %v427_v57 = vpop.f32.mrb[10].mxu0 }
 0x38a   :  { %v428_v58 = vadd.f32 %v427_v57, %v356_v56  ;;  %v1098_v59 = vpop.f32.mrb[11].mxu0 }
 0x38c   :  { %1099 = vmatprep.subr.msk.mxu1 %vm452_vm5, %v428_v58  ;;  %935 = vst.msk [vmem:[#allocation8] sm:$0x7] %vm934_vm6, %v428_v58 }
 0x38d   :  { %1100 = vmatpush3.msk.msra.mxu1 %vm452_vm5, %v428_v58  ;;  %v1111_v2 = vpop.f32.mrb[12].mxu0  ;;  %v767_v58 = vld [vmem:[#allocation5 + $0xd0] sm:$0x7] }
 0x38e   :  { %1102 = vmatmul.mubr.msk.f32.vlgmr.msra.gmra.mrb[0].mxu1 %vm439_vm4, %v436_v61  ;;  %1196 = vmatprep.subr.bf16.mxu1 %v1195_v60  ;;  %v619_v4 = vpop.f32.mrb[13].mxu0 }
 0x38f   :  { %1104 = vmatprep.mubr.msk.f32.mxu1 %vm439_vm4, %v437_v62  ;;  %1198 = vmatpush3.bf16.msra.mxu1 %v1195_v60 }
 0x390   :  { %1200 = vmatprep.subr.bf16.mxu1 %v1199_v3 }
 0x391   :  { %v1114_v5 = vpop.f32.mrb[14].mxu0 }
 0x392   :  { %1105 = vmatmul.mubr.msk.f32.gmra.mrb[2].mxu1 %vm439_vm4, %v438_v63  ;;  %v629_v6 = vpop.f32.mrb[15].mxu0 }
 0x393   :  { %1202 = vmatpush3.bf16.msra.mxu1 %v1199_v3 }
 0x394   :  { %1209 = vmatprep.subr.bf16.mxu1 %v1350_v26 }
 0x461   :  { %v1103_v7 = vpop.f32.mrb[0].mxu1 }
 0x462   :  { %v625_v8 = vadd.f32 %v1111_v2, %v1103_v7  ;;  %v522_v9 = vpop.f32.mrb[1].mxu1 }
 0x463   :  { %v620_v10 = vadd.f32 %v619_v4, %v522_v9 }
 0x465   :  { %v1106_v11 = vpop.f32.mrb[2].mxu1  ;;  %1123 = vmatprep.mubr.msk.f32.mxu1 %vm176_vm2, %v620_v10 }
 0x466   :  { %v635_v12 = vadd.f32 %v1114_v5, %v1106_v11  ;;  %v532_v13 = vpop.f32.mrb[3].mxu1  ;;  %1124 = vmatmul.mubr.msk.f32.vlgmr.msra.gmra.mrb[4].mxu1 %vm176_vm2, %v625_v8 }
 0x467   :  { %v630_v14 = vadd.f32 %v629_v6, %v532_v13  ;;  %1211 = vmatpush3.bf16.msra.mxu1 %v1210_v18 }
 0x468   :  { %1212 = vmatprep.subr.bf16.mxu1 %v1350_v26 }
 0x469   :  { %1126 = vmatprep.mubr.msk.f32.mxu1 %vm176_vm2, %v630_v14 }
 0x46a   :  { %1127 = vmatmul.mubr.msk.f32.gmra.mrb[6].mxu1 %vm176_vm2, %v635_v12 }
 0x46b   :  { %1172 = vmatprep.mubr.msk.f32.mxu1 %vm1351_vm3, %v1352_v27  ;;  %1214 = vmatpush3.bf16.msra.mxu1 %v1213_v20  ;;  %v849_v27 = vld [vmem:[#allocation5 + $0x140] sm:$0xff] }
 0x46c   :  { %1215 = vmatprep.subr.bf16.mxu1 %v1350_v26  ;;  %v1222_v30 = vpack.c.bf16 %v850_v29, %v849_v27 }
 0x46f   :  { %1217 = vmatpush3.bf16.msra.mxu1 %v1216_v23 }
 0x470   :  { %1218 = vmatprep.subr.bf16.mxu1 %v1350_v26 }
 0x473   :  { %1220 = vmatpush3.bf16.msra.mxu1 %v1219_v28 }
 0x474   :  { %1221 = vmatprep.subr.bf16.mxu1 %v1350_v26 }
 0x477   :  { %1223 = vmatpush3.bf16.msra.mxu1 %v1222_v30 }
 0x478   :  { %1224 = vmatprep.subr.bf16.mxu1 %v1350_v26 }
 0x47b   :  { %1226 = vmatpush3.bf16.msra.mxu1 %v1225_v33 }
 0x47c   :  { %1227 = vmatprep.subr.bf16.mxu1 %v1350_v26 }
 0x47f   :  { %1229 = vmatpush3.bf16.msra.mxu1 %v1228_v36 }
 0x480   :  { %1230 = vmatprep.subr.bf16.mxu1 %v1350_v26 }
 0x483   :  { %1232 = vmatpush3.bf16.msra.mxu1 %v1231_v39 }
 0x539   :  { %v1125_v42 = vpop.f32.mrb[4].mxu1 }
 0x53a   :  { %v750_v43 = vadd.f32 %v1125_v42, %v654_v40  ;;  %v744_v44 = vpop.f32.mrb[5].mxu1 }
 0x53b   :  { %v745_v45 = vadd.f32 %v744_v44, %v649_v41 }
 0x53c   :  { %v764_v46 = vmax.f32 %v750_v43, 0.0 }
 0x53d   :  { %v763_v48 = vmax.f32 %v745_v45, 0.0  ;;  %v1128_v49 = vpop.f32.mrb[6].mxu1 }
 0x53e   :  { %v760_v51 = vadd.f32 %v1128_v49, %v664_v47  ;;  %v754_v52 = vpop.f32.mrb[7].mxu1 }
 0x53f   :  { %v1204_v53 = vpack.c.bf16 %v764_v46, %v763_v48  ;;  %v755_v54 = vadd.f32 %v754_v52, %v659_v50 }
 0x540   :  { %v766_v55 = vmax.f32 %v760_v51, 0.0 }
 0x541   :  { %v765_v56 = vmax.f32 %v755_v54, 0.0  ;;  %1205 = vmatpush3.bf16.msra.mxu0 %v1204_v53 }
 0x542   :  { %1206 = vmatprep.subr.bf16.mxu0 %v1350_v26 }
 0x543   :  { %v1207_v57 = vpack.c.bf16 %v766_v55, %v765_v56 }
 0x545   :  { %1208 = vmatpush3.bf16.msra.mxu0 %v1207_v57 }
 0x548   :  { %1138 = vmatmul.mubr.msk.f32.vlgmr.msra.gmra.mrb[16].mxu0 %vm176_vm2, %v767_v58 }
 0x61b   :  { %v837_v59 = vpop.f32.mrb[16].mxu0 }
 0x61c   :  { %v1139_v60 = vpop.f32.mrb[17].mxu0  ;;  %1173 = vmatmul.mubr.f32.vlgmr.msra.gmra.mrb[8].mxu1 %v837_v59 }
 0x61d   :  { %1304 = shalt.err (!%p1301_p6)
}
 0x61e   :  { %s1305_s14 = scalar_lea.hbm %s1498_s3, 64 }
 0x61f   :  { %p1306_p7 = scmp.ne.s32.totalorder %s1498_s3, %s1305_s14  ;;  %p1309_p8 = scmp.lt.u32.totalorder %s1305_s14, %s1498_s3 }
 0x621   :  { %p1311_p9 = pnand %p1309_p8, %p1306_p7 }
 0x623   :  { %1314 = shalt.err (!%p1311_p9)
}
 0x624   :  { %955 = dma.vmem_to_hbm [thread:$0]  %s953_s10, 64, %s1498_s3, [#allocation9]   ;;  %v861_v26 = vpop.permute.xlu1 %860 }
 0x625   :  { %s1354_s21 = smov [#allocation7]  }
 0x626   :  { %s942_s22 = sshll.u32 %s1354_s21, 4  ;;  %s943_s22 = int_to_ptr.vmem [resolvable:$true] %s942_s22 }
 0x627   :  { %s1315_s23 = scalar_lea.vmem %s943_s22, 64  ;;  %p1320_p11 = scmp.lt.s32.totalorder %s943_s22, %s943_s22 }
 0x628   :  { %p1316_p10 = scmp.ne.s32.totalorder %s943_s22, %s1315_s23  ;;  %p1321_p12 = scmp.lt.s32.totalorder %s1315_s23, %s1315_s23 }
 0x62a   :  { %p1322_p13 = por %p1321_p12, %p1320_p11 }
 0x62c   :  { %p1323_p0 = pnand %p1322_p13, %p1316_p10 }
 0x6ef   :  { %v929_v61 = vpop.f32.mrb[8].mxu1 }
 0x6f0   :  { %v930_v62 = vadd.f32 %v929_v61, %v861_v26  ;;  %v1174_v63 = vpop.f32.mrb[9].mxu1 }
 0x6f2   :  { %933 = vst [vmem:[#allocation7] sm:$0x7] %v930_v62 }
 0x6f3   :  { %1326 = shalt.err (!%p1323_p0)
}
 0x6f4   :  { %s1327_s26 = scalar_lea.hbm %s1497_s2, 64 }
 0x6f5   :  { %p1328_p1 = scmp.ne.s32.totalorder %s1497_s2, %s1327_s26  ;;  %p1331_p2 = scmp.lt.u32.totalorder %s1327_s26, %s1497_s2 }
 0x6f7   :  { %p1333_p3 = pnand %p1331_p2, %p1328_p1 }
 0x6f9   :  { %1336 = shalt.err (!%p1333_p3)
}
 0x6fa   :  { %945 = dma.vmem_to_hbm [thread:$0]  %s943_s22, 64, %s1497_s2, [#allocation4]  }
 0x6fb   :  { %1341 = dma.done.wait [#allocation4], 64  }
 0x6fc   :  { %1342 = vsyncadd [#allocation4], 4294967232 }
 0x6fd   :  { %1343 = dma.done.wait [#allocation9], 64  }
 0x6fe   :  { %1344 = vsyncadd [#allocation9], 4294967232 }
 0x6ff   :  { %962 = vsyncpa [#allocation3], 1 }
 0x700   :  { %963 = vsyncpa [#allocation6], 1 }
 0x701   :  { %964 = vsyncpa [#allocation4], 1 }
 0x702   :  { %965 = vsyncpa [#allocation9], 1 }

</bundles_post_ra>
